<compile_context>
chip_gen: v6e
topology: v6e:2x2x1
jax: 0.10.0
libtpu: 0.0.40
codegen_flags: <defaults>
</compile_context>

<pallas_src>
import jax
import jax.numpy as jnp
from jax.experimental import pallas as pl
from jax.experimental.pallas import tpu as pltpu


MIN_PALLAS_ELEMS = 1 << 18          # below this, just let XLA do it
TARGET_BLOCK_BYTES = 4 << 20        # ~4 MiB blocks: good on v5e/v6e/v7x
VMEM_LIMIT_BYTES = 48 << 20         # safe on every generation's physical VMEM


def _sigmoid_kernel(x_ref, o_ref):
    # Upcast to f32 for the math (free under the HBM-bound roofline; required
    # for accuracy / v5e which lacks bf16 VPU/EUP paths), store back narrow.
    x = x_ref[...].astype(jnp.float32)
    y = 0.5 * (jnp.tanh(0.5 * x) + 1.0)   # sigmoid via EUP tanh
    o_ref[...] = y.astype(o_ref.dtype)


def _pick_width(n: int):
    """Largest lane-dense width (multiple of 128) that divides n exactly."""
    for w in (512, 256, 128):
        if n % w == 0:
            return w
    return None


def apc_forward(x: jax.Array, *, min_pallas_elems: int = MIN_PALLAS_ELEMS) -> jax.Array:
    """Elementwise sigmoid. Pallas kernel for large float tensors, XLA otherwise."""
    orig_shape = x.shape
    n = int(x.size)

    # Fast paths: tiny tensors, non-float dtypes, or element counts that are
    # not a multiple of 128 (avoids a pad+slice HBM round-trip entirely).
    if (n < min_pallas_elems) or (not jnp.issubdtype(x.dtype, jnp.floating)):
        return jax.nn.sigmoid(x)
    width = _pick_width(n)
    if width is None:
        # TODO(synk): uncommon odd sizes — cheaper to let XLA fuse than to pad.
        return jax.nn.sigmoid(x)

    rows = n // width
    slab = x.reshape(rows, width)          # contiguous reshape: pure bitcast
    itemsize = slab.dtype.itemsize
    row_bytes = width * itemsize

    # Block row count: ~TARGET_BLOCK_BYTES per block, rounded to a multiple of
    # 64 rows (covers f32/bf16/fp8 sublane packing), and capped so the grid
    # has at least 2 blocks (both v7x TensorCores get work).
    max_block_rows = max(64, (TARGET_BLOCK_BYTES // row_bytes) // 64 * 64)
    half_rows = ((pl.cdiv(rows, 2) + 63) // 64) * 64
    block_rows = min(max_block_rows, half_rows)
    if block_rows >= rows:
        block_rows = rows                  # single full-extent block (always legal)

    grid = (pl.cdiv(rows, block_rows),)    # partial last block is fine (masked write)

    cost = pl.CostEstimate(
        flops=2 * n,                       # mul + add per element
        transcendentals=n,                 # tanh per element
        bytes_accessed=2 * n * itemsize,   # read + write
    )

    out_slab = pl.pallas_call(
        _sigmoid_kernel,
        out_shape=jax.ShapeDtypeStruct((rows, width), slab.dtype),
        grid_spec=pltpu.PrefetchScalarGridSpec(
            num_scalar_prefetch=0,
            grid=grid,
            in_specs=[pl.BlockSpec((block_rows, width), lambda i: (i, 0))],
            out_specs=pl.BlockSpec((block_rows, width), lambda i: (i, 0)),
        ),
        compiler_params=pltpu.CompilerParams(
            dimension_semantics=("parallel",),
            vmem_limit_bytes=VMEM_LIMIT_BYTES,
        ),
        cost_estimate=cost,
    )(slab)

    return out_slab.reshape(orig_shape)    # bitcast back, no slice/pad


if __name__ == "__main__":
    key = jax.random.PRNGKey(0)
    k1, k2, k3 = jax.random.split(key, 3)

    # Canonical small NCHW input from the module spec.
    x_small = jax.random.normal(k1, (2, 4, 16, 16), dtype=jnp.float32)

    # Exercise the Pallas kernel directly on the small shape (forced), and the
    # production small-input fast path.
    y_pallas = apc_forward(x_small, min_pallas_elems=0)
    y_fast = apc_forward(x_small)
    jax.block_until_ready((y_pallas, y_fast))
    ref_small = jax.nn.sigmoid(x_small)
    assert y_pallas.shape == x_small.shape and y_pallas.dtype == x_small.dtype
    assert float(jnp.max(jnp.abs(y_pallas - ref_small))) < 2e-6
    assert float(jnp.max(jnp.abs(y_fast - ref_small))) < 2e-6

    # Larger f32 input: 2-block parallel grid with a partial last block.
    x_big = jax.random.normal(k2, (5, 7, 96, 128), dtype=jnp.float32)
    y_big = apc_forward(x_big)
    jax.block_until_ready(y_big)
    assert float(jnp.max(jnp.abs(y_big - jax.nn.sigmoid(x_big)))) < 2e-6

    # bf16 input: HBM/VMEM stay bf16, math runs in f32 inside the kernel.
    x_bf16 = jax.random.normal(k3, (8, 64, 64, 64), dtype=jnp.bfloat16)
    y_bf16 = apc_forward(x_bf16)
    jax.block_until_ready(y_bf16)
    ref_bf16 = jax.nn.sigmoid(x_bf16.astype(jnp.float32)).astype(jnp.bfloat16)
    err = jnp.max(jnp.abs(y_bf16.astype(jnp.float32) - ref_bf16.astype(jnp.float32)))
    assert y_bf16.dtype == jnp.bfloat16 and float(err) < 1e-2

    print("KERNEL_OK")
</pallas_src>

<mosaic_0001>
module attributes {stable_mosaic.version = 11 : i64} {
  func.func @_sigmoid_kernel(%arg0: i32, %arg1: memref<4x512xf32, #tpu.memory_space<vmem>>, %arg2: memref<4x512xf32, #tpu.memory_space<vmem>>) attributes {dimension_semantics = [#tpu.dimension_semantics<parallel>], iteration_bounds = array<i64: 1>, scalar_prefetch = 0 : i64, scratch_operands = 0 : i64, tpu.core_type = #tpu.core_type<tc>, window_params = [{transform_indices = @transform_0, window_bounds = array<i64: 4, 512>}, {transform_indices = @transform_1, window_bounds = array<i64: 4, 512>}]} {
    %c0 = arith.constant 0 : index
    %c0_0 = arith.constant 0 : index
    %0 = vector.load %arg1[%c0, %c0_0] : memref<4x512xf32, #tpu.memory_space<vmem>>, vector<4x512xf32>
    %cst = arith.constant 5.000000e-01 : f32
    %1 = vector.broadcast %cst : f32 to vector<4x512xf32>
    %2 = arith.mulf %1, %0 : vector<4x512xf32>
    %3 = math.tanh %2 : vector<4x512xf32>
    %cst_1 = arith.constant 1.000000e+00 : f32
    %4 = vector.broadcast %cst_1 : f32 to vector<4x512xf32>
    %5 = arith.addf %3, %4 : vector<4x512xf32>
    %cst_2 = arith.constant 5.000000e-01 : f32
    %6 = vector.broadcast %cst_2 : f32 to vector<4x512xf32>
    %7 = arith.mulf %6, %5 : vector<4x512xf32>
    %c0_3 = arith.constant 0 : index
    %c0_4 = arith.constant 0 : index
    %8 = vector.load %arg2[%c0_3, %c0_4] : memref<4x512xf32, #tpu.memory_space<vmem>>, vector<4x512xf32>
    tpu.vector_store %arg2[%c0_3, %c0_4], %7 {strides = array<i32>} : memref<4x512xf32, #tpu.memory_space<vmem>>, vector<4x512xf32>,
    return
  }
  func.func @transform_0(%arg0: i32) -> (i32, i32) {
    %c0_i32 = arith.constant 0 : i32
    %c0_i32_0 = arith.constant 0 : i32
    return %arg0, %c0_i32 : i32, i32
  }
  func.func @transform_1(%arg0: i32) -> (i32, i32) {
    %c0_i32 = arith.constant 0 : i32
    %c0_i32_0 = arith.constant 0 : i32
    return %arg0, %c0_i32 : i32, i32
  }
}

</mosaic_0001>

<bundles_post_ra>
// kernel: tpu_custom_call.1
= control target key start
LH: loop header
LB: loop body
LE: loop exit
PB: predicated region body
PF: predicated region fallthrough
CT: control target
= control target key end

     0   :  { %6 = vsyncpa [#allocation3], 0  ;;  %s116_s0 = inlined_call_operand.hbm [shape: f32[4,512], index: 0, kind: input, shape index: {}]   ;;  %s117_s1 = inlined_call_operand.hbm [shape: f32[4,512], index: 1, kind: output, shape index: {}]  }
   0x1   :  { %7 = vsyncpa [#allocation4], 0  ;;  %s98_s6 = smov [#allocation2]  }
   0x2   :  { %s14_s7 = sshll.u32 %s98_s6, 4  ;;  %s15_s7 = int_to_ptr.vmem [resolvable:$true] %s14_s7 }
   0x3   :  { %s62_s8 = scalar_lea.vmem %s15_s7, 256  ;;  %p67_p1 = scmp.lt.s32.totalorder %s15_s7, %s15_s7 }
   0x4   :  { %p63_p0 = scmp.ne.s32.totalorder %s15_s7, %s62_s8  ;;  %p68_p2 = scmp.lt.s32.totalorder %s62_s8, %s62_s8 }
   0x6   :  { %p69_p3 = por %p68_p2, %p67_p1 }
   0x8   :  { %p70_p4 = pnand %p69_p3, %p63_p0 }
   0xa   :  { %73 = shalt.err (!%p70_p4)
}
   0xb   :  { %17 = dma.hbm_to_vmem [thread:$0]  %s116_s0, 256, %s15_s7, [#allocation3]  }
   0xc   :  { %94 = dma.done.wait [#allocation3], 256  }
   0xd   :  { %95 = vsyncadd [#allocation3], 4294967040  ;;  %v21_v0 = vld [vmem:[#allocation2] sm:$0xff]  ;;  %v22_v1 = vld [vmem:[#allocation2 + $0x8] sm:$0xff]  ;;  %s99_s11 = smov [#allocation5]  }
   0xe   :  { %v23_v2 = vmul.f32 0.5, %v21_v0  ;;  %v24_v3 = vmul.f32 0.5, %v22_v1  ;;  %s39_s12 = sshll.u32 %s99_s11, 4  ;;  %s40_s12 = int_to_ptr.vmem [resolvable:$true] %s39_s12 }
   0xf   :  { %s74_s0 = scalar_lea.vmem %s40_s12, 256  ;;  %p79_p6 = scmp.lt.s32.totalorder %s40_s12, %s40_s12 }
  0x10   :  { %50 = vtanh.f32 %v23_v2  ;;  %p75_p5 = scmp.ne.s32.totalorder %s40_s12, %s74_s0  ;;  %p80_p7 = scmp.lt.s32.totalorder %s74_s0, %s74_s0 }
  0x11   :  { %52 = vtanh.f32 %v24_v3 }
  0x12   :  { %p81_p8 = por %p80_p7, %p79_p6 }
  0x14   :  { %p82_p9 = pnand %p81_p8, %p75_p5 }
  0x1d   :  { %v51_v4 = vpop.eup %50 }
  0x1e   :  { %v53_v5 = vpop.eup %52  ;;  %v27_v6 = vadd.f32 1.0, %v51_v4 }
  0x1f   :  { %v28_v7 = vadd.f32 1.0, %v53_v5 }
  0x20   :  { %v29_v8 = vmul.f32 0.5, %v27_v6 }
  0x21   :  { %v30_v9 = vmul.f32 0.5, %v28_v7 }
  0x22   :  { %31 = vst [vmem:[#allocation5] sm:$0xff] %v29_v8 }
  0x23   :  { %32 = vst [vmem:[#allocation5 + $0x8] sm:$0xff] %v30_v9 }
  0x24   :  { %85 = shalt.err (!%p82_p9)
}
  0x25   :  { %42 = dma.vmem_to_hbm [thread:$0]  %s40_s12, 256, %s117_s1, [#allocation4]  }
  0x26   :  { %96 = dma.done.wait [#allocation4], 256  }
  0x27   :  { %97 = vsyncadd [#allocation4], 4294967040 }
  0x28   :  { %46 = vsyncpa [#allocation3], 1 }
  0x29   :  { %47 = vsyncpa [#allocation4], 1 }

</bundles_post_ra>
